<compile_context>
chip_gen: v5e
topology: v5e:2x2
jax: 0.10.0
libtpu: 0.0.40
codegen_flags: <defaults>
</compile_context>

<pallas_src>
import jax
import jax.numpy as jnp
from jax.experimental import pallas as pl
from jax.experimental.pallas import tpu as pltpu


def combine_kernel(x1_ref, x2_ref, wa_t_ref, wb_t_ref, bias_ref, o_ref):
    # x1_ref: (C1, T), x2_ref: (C2, T), wa_t: (Cout, C1), wb_t: (Cout, C2), bias: (Cout, 1)
    x1 = jnp.maximum(x1_ref[...], 0)                          # ReLU branch
    acc = jnp.dot(wa_t_ref[...], x1, preferred_element_type=jnp.float32)
    acc = acc + jnp.dot(wb_t_ref[...], x2_ref[...], preferred_element_type=jnp.float32)
    acc = acc + bias_ref[...]                                 # folded conv-bias + BN shift (f32)
    o_ref[...] = acc.astype(o_ref.dtype)                      # lane-dense (Cout, T) store


def _cdiv(a, b):
    return -(-a // b)


def _col_bytes(c, itemsize):
    """VMEM bytes one spatial column occupies for a c-channel tensor (sublane-padded)."""
    sub = max(8, 32 // itemsize)              # 8 sublanes (f32) / 16 packed rows (bf16)
    return _cdiv(c, sub) * sub * itemsize


def _pick_tile(hw, n, c1, c2, cout, itemsize, *, max_tile_cols, vmem_budget_bytes,
               min_grid_steps):
    """128-aligned spatial tile: as big as VMEM allows, but keep >= min_grid_steps steps."""
    bytes_per_col = 2 * (_col_bytes(c1, itemsize) + _col_bytes(c2, itemsize)
                         + _col_bytes(cout, itemsize))        # double-buffered in + out
    cap = max(128, vmem_budget_bytes // bytes_per_col)
    hw_padded = _cdiv(hw, 128) * 128
    tile = min(max_tile_cols, cap, hw_padded)
    tile = max(128, (tile // 128) * 128)
    # Keep enough grid steps for v7x's 2 TensorCores + pipelining overlap.
    while tile > 128 and n * _cdiv(hw, tile) < min_grid_steps:
        tile = max(128, ((tile // 2) // 128) * 128)
    return tile, bytes_per_col


def combine_forward(x1_nchw, x2_nchw, params, *, max_tile_cols=131072,
                    vmem_budget_bytes=20 << 20, min_grid_steps=8):
    """x1_nchw: (N, C1, H, W), x2_nchw: (N, C2, H, W) -> (N, Cout, H, W)."""
    wa, wb, bias, gamma, beta, running_mean, running_var, eps = params
    n, c1, h, w = x1_nchw.shape
    n2, c2, h2, w2 = x2_nchw.shape
    assert (n2, h2, w2) == (n, h, w), "x1/x2 batch & spatial dims must match"
    assert x1_nchw.dtype == x2_nchw.dtype, "x1/x2 must share a dtype"
    cout = wa.shape[1]
    # NOTE: weights here are (Cin, Cout); PyTorch Conv2d stores (Cout, Cin, 1, 1) —
    # the integration layer must transpose. Assert to avoid silent wrong answers.
    assert wa.shape == (c1, cout) and wb.shape == (c2, cout), "weights must be (Cin, Cout)"

    dtype = x1_nchw.dtype
    itemsize = jnp.dtype(dtype).itemsize
    hw = h * w

    # Free reshapes only — no HBM transpose round-trips.
    x1 = x1_nchw.reshape(n, c1, hw)
    x2 = x2_nchw.reshape(n, c2, hw)

    # Fold eval-mode BatchNorm into the 1x1-conv weights/bias (all folding in f32).
    inv_std = 1.0 / jnp.sqrt(running_var.astype(jnp.float32) + eps)
    scale = gamma.astype(jnp.float32) * inv_std                       # (Cout,)
    shift = beta.astype(jnp.float32) - running_mean.astype(jnp.float32) * scale
    wa_t = (wa.astype(jnp.float32) * scale[None, :]).T.astype(dtype)  # (Cout, C1)
    wb_t = (wb.astype(jnp.float32) * scale[None, :]).T.astype(dtype)  # (Cout, C2)
    bias_f = (bias.astype(jnp.float32) * scale + shift).reshape(cout, 1)  # f32 (Cout, 1)

    tile, bytes_per_col = _pick_tile(
        hw, n, c1, c2, cout, itemsize,
        max_tile_cols=max_tile_cols, vmem_budget_bytes=vmem_budget_bytes,
        min_grid_steps=min_grid_steps)
    grid = (n, _cdiv(hw, tile))          # ragged last block handled by Pallas masking

    # Raise the scoped-VMEM limit explicitly (v5e default is 16 MiB); stay well under
    # v7x's 64 MiB physical VMEM.
    weights_bytes = cout * (c1 + c2) * itemsize + cout * 4
    vmem_needed = bytes_per_col * tile + weights_bytes + (1 << 20)
    vmem_limit = int(min(max(2 * vmem_needed, 32 << 20), 56 << 20))

    bytes_accessed = itemsize * n * hw * (c1 + c2 + cout)             # x1 + x2 + out
    flops = 2 * n * hw * (c1 + c2) * cout
    cost = pl.CostEstimate(flops=flops, transcendentals=0, bytes_accessed=bytes_accessed)

    out = pl.pallas_call(
        combine_kernel,
        out_shape=jax.ShapeDtypeStruct((n, cout, hw), dtype),
        grid_spec=pltpu.PrefetchScalarGridSpec(
            num_scalar_prefetch=0,
            grid=grid,
            in_specs=[
                pl.BlockSpec((None, c1, tile), lambda b, j: (b, 0, j)),
                pl.BlockSpec((None, c2, tile), lambda b, j: (b, 0, j)),
                pl.BlockSpec((cout, c1), lambda b, j: (0, 0)),
                pl.BlockSpec((cout, c2), lambda b, j: (0, 0)),
                pl.BlockSpec((cout, 1), lambda b, j: (0, 0)),
            ],
            out_specs=pl.BlockSpec((None, cout, tile), lambda b, j: (b, 0, j)),
        ),
        compiler_params=pltpu.CompilerParams(
            dimension_semantics=("parallel", "parallel"),
            vmem_limit_bytes=vmem_limit),
        cost_estimate=cost,
    )(x1, x2, wa_t, wb_t, bias_f)

    return out.reshape(n, cout, h, w)


def reference_forward(x1_nchw, x2_nchw, params):
    """Pure-JAX reference matching the PyTorch semantics (eval-mode BN), computed in f32."""
    wa, wb, bias, gamma, beta, running_mean, running_var, eps = params
    x1 = jnp.maximum(x1_nchw.astype(jnp.float32), 0.0)
    concat = jnp.concatenate([x1, x2_nchw.astype(jnp.float32)], axis=1)   # NCHW
    w_full = jnp.concatenate([wa, wb], axis=0)                            # (Cin_tot, Cout)
    out = jnp.einsum("nchw,cd->ndhw", concat, w_full) + bias[None, :, None, None]
    inv_std = 1.0 / jnp.sqrt(running_var + eps)
    out = (out - running_mean[None, :, None, None]) * (gamma * inv_std)[None, :, None, None] \
          + beta[None, :, None, None]
    return out


if __name__ == "__main__":
    # Module config: Combine(in_channels=4, out_channels=8, last=False)
    # -> conv expects 3*in_channels = 12 input channels:
    #    x1 has 2*in_channels = 8 channels, x2 has in_channels = 4.
    in_channels, out_channels = 4, 8
    c1, c2 = 2 * in_channels, in_channels
    N, H, W = 2, 16, 16

    key = jax.random.PRNGKey(0)
    k1, k2, k3, k4, k5, k6, k7, k8, k9 = jax.random.split(key, 9)

    x1 = jax.random.normal(k1, (N, c1, H, W), dtype=jnp.float32)
    x2 = jax.random.normal(k2, (N, c2, H, W), dtype=jnp.float32)

    # Deterministic parameters (Conv2d 1x1 weight laid out as (Cin, Cout)).
    wa = jax.random.normal(k3, (c1, out_channels), dtype=jnp.float32) * 0.1
    wb = jax.random.normal(k4, (c2, out_channels), dtype=jnp.float32) * 0.1
    bias = jax.random.normal(k5, (out_channels,), dtype=jnp.float32) * 0.05
    gamma = 1.0 + 0.1 * jax.random.normal(k6, (out_channels,), dtype=jnp.float32)
    beta = 0.1 * jax.random.normal(k7, (out_channels,), dtype=jnp.float32)
    running_mean = 0.1 * jax.random.normal(k8, (out_channels,), dtype=jnp.float32)
    running_var = jnp.abs(1.0 + 0.1 * jax.random.normal(k9, (out_channels,), dtype=jnp.float32))
    eps = 1e-5
    params = (wa, wb, bias, gamma, beta, running_mean, running_var, eps)

    ref = reference_forward(x1, x2, params)

    # f32 path.
    out = jax.block_until_ready(combine_forward(x1, x2, params))
    assert out.shape == (N, out_channels, H, W)
    assert jnp.allclose(out, ref, atol=1e-4, rtol=1e-4), "f32 mismatch vs reference"

    # bf16 I/O path (half the HBM traffic; f32 accumulation inside the kernel).
    out_bf16 = jax.block_until_ready(
        combine_forward(x1.astype(jnp.bfloat16), x2.astype(jnp.bfloat16), params))
    assert out_bf16.dtype == jnp.bfloat16
    assert jnp.allclose(out_bf16.astype(jnp.float32), ref, atol=1e-1, rtol=5e-2), \
        "bf16 mismatch vs reference"

    print("KERNEL_OK")
</pallas_src>

<mosaic_0001>
module attributes {stable_mosaic.version = 11 : i64} {
  func.func @combine_kernel(%arg0: i32, %arg1: i32, %arg2: memref<1x8x128xf32, #tpu.memory_space<vmem>>, %arg3: memref<1x4x128xf32, #tpu.memory_space<vmem>>, %arg4: memref<8x8xf32, #tpu.memory_space<vmem>>, %arg5: memref<8x4xf32, #tpu.memory_space<vmem>>, %arg6: memref<8x1xf32, #tpu.memory_space<vmem>>, %arg7: memref<1x8x128xf32, #tpu.memory_space<vmem>>) attributes {dimension_semantics = [#tpu.dimension_semantics<parallel>, #tpu.dimension_semantics<parallel>], iteration_bounds = array<i64: 2, 2>, scalar_prefetch = 0 : i64, scratch_operands = 0 : i64, tpu.core_type = #tpu.core_type<tc>, window_params = [{transform_indices = @transform_0, window_bounds = array<i64: 1, 8, 128>}, {transform_indices = @transform_1, window_bounds = array<i64: 1, 4, 128>}, {pipeline_mode = #tpu.pipeline_mode<synchronous>, transform_indices = @transform_2, window_bounds = array<i64: 8, 8>}, {pipeline_mode = #tpu.pipeline_mode<synchronous>, transform_indices = @transform_3, window_bounds = array<i64: 8, 4>}, {pipeline_mode = #tpu.pipeline_mode<synchronous>, transform_indices = @transform_4, window_bounds = array<i64: 8, 1>}, {transform_indices = @transform_5, window_bounds = array<i64: 1, 8, 128>}]} {
    %c0 = arith.constant 0 : index
    %c0_0 = arith.constant 0 : index
    %c0_1 = arith.constant 0 : index
    %0 = vector.load %arg2[%c0, %c0_0, %c0_1] : memref<1x8x128xf32, #tpu.memory_space<vmem>>, vector<1x8x128xf32>
    %1 = vector.shape_cast %0 : vector<1x8x128xf32> to vector<8x128xf32>
    %cst = arith.constant 0.000000e+00 : f32
    %2 = vector.broadcast %cst : f32 to vector<8x128xf32>
    %3 = arith.maximumf %1, %2 : vector<8x128xf32>
    %c0_2 = arith.constant 0 : index
    %c0_3 = arith.constant 0 : index
    %4 = vector.load %arg4[%c0_2, %c0_3] : memref<8x8xf32, #tpu.memory_space<vmem>>, vector<8x8xf32>
    %cst_4 = arith.constant dense<0.000000e+00> : vector<8x128xf32>
    %5 = tpu.matmul %4, %3, %cst_4 {dimension_numbers = #tpu.dot_dimension_numbers<[1], [0], [0], [1], [0, 0, 1, 1], [], []>} : vector<8x8xf32>, vector<8x128xf32>, vector<8x128xf32> -> vector<8x128xf32>
    %c0_5 = arith.constant 0 : index
    %c0_6 = arith.constant 0 : index
    %6 = vector.load %arg5[%c0_5, %c0_6] : memref<8x4xf32, #tpu.memory_space<vmem>>, vector<8x4xf32>
    %c0_7 = arith.constant 0 : index
    %c0_8 = arith.constant 0 : index
    %c0_9 = arith.constant 0 : index
    %7 = vector.load %arg3[%c0_7, %c0_8, %c0_9] : memref<1x4x128xf32, #tpu.memory_space<vmem>>, vector<1x4x128xf32>
    %8 = vector.shape_cast %7 : vector<1x4x128xf32> to vector<4x128xf32>
    %cst_10 = arith.constant dense<0.000000e+00> : vector<8x128xf32>
    %9 = tpu.matmul %6, %8, %cst_10 {dimension_numbers = #tpu.dot_dimension_numbers<[1], [0], [0], [1], [0, 0, 1, 1], [], []>} : vector<8x4xf32>, vector<4x128xf32>, vector<8x128xf32> -> vector<8x128xf32>
    %10 = arith.addf %5, %9 : vector<8x128xf32>
    %c0_11 = arith.constant 0 : index
    %c0_12 = arith.constant 0 : index
    %11 = vector.load %arg6[%c0_11, %c0_12] : memref<8x1xf32, #tpu.memory_space<vmem>>, vector<8x1xf32>
    %12 = vector.broadcast %11 : vector<8x1xf32> to vector<8x128xf32>
    %13 = arith.addf %10, %12 : vector<8x128xf32>
    %c0_13 = arith.constant 0 : index
    %c0_14 = arith.constant 0 : index
    %c0_15 = arith.constant 0 : index
    %14 = vector.load %arg7[%c0_13, %c0_14, %c0_15] : memref<1x8x128xf32, #tpu.memory_space<vmem>>, vector<1x8x128xf32>
    %15 = vector.shape_cast %14 : vector<1x8x128xf32> to vector<8x128xf32>
    %16 = vector.shape_cast %13 : vector<8x128xf32> to vector<1x8x128xf32>
    tpu.vector_store %arg7[%c0_13, %c0_14, %c0_15], %16 {strides = array<i32>} : memref<1x8x128xf32, #tpu.memory_space<vmem>>, vector<1x8x128xf32>,
    return
  }
  func.func @transform_0(%arg0: i32, %arg1: i32) -> (i32, i32, i32) {
    %c0_i32 = arith.constant 0 : i32
    %c0_i32_0 = arith.constant 0 : i32
    return %arg0, %c0_i32, %arg1 : i32, i32, i32
  }
  func.func @transform_1(%arg0: i32, %arg1: i32) -> (i32, i32, i32) {
    %c0_i32 = arith.constant 0 : i32
    %c0_i32_0 = arith.constant 0 : i32
    return %arg0, %c0_i32, %arg1 : i32, i32, i32
  }
  func.func @transform_2(%arg0: i32, %arg1: i32) -> (i32, i32) {
    %c0_i32 = arith.constant 0 : i32
    %c0_i32_0 = arith.constant 0 : i32
    %c0_i32_1 = arith.constant 0 : i32
    return %c0_i32, %c0_i32_0 : i32, i32
  }
  func.func @transform_3(%arg0: i32, %arg1: i32) -> (i32, i32) {
    %c0_i32 = arith.constant 0 : i32
    %c0_i32_0 = arith.constant 0 : i32
    %c0_i32_1 = arith.constant 0 : i32
    return %c0_i32, %c0_i32_0 : i32, i32
  }
  func.func @transform_4(%arg0: i32, %arg1: i32) -> (i32, i32) {
    %c0_i32 = arith.constant 0 : i32
    %c0_i32_0 = arith.constant 0 : i32
    %c0_i32_1 = arith.constant 0 : i32
    return %c0_i32, %c0_i32_0 : i32, i32
  }
  func.func @transform_5(%arg0: i32, %arg1: i32) -> (i32, i32, i32) {
    %c0_i32 = arith.constant 0 : i32
    %c0_i32_0 = arith.constant 0 : i32
    return %arg0, %c0_i32, %arg1 : i32, i32, i32
  }
}

</mosaic_0001>

<bundles_post_ra>
// kernel: tpu_custom_call.1
= control target key start
LH: loop header
LB: loop body
LE: loop exit
PB: predicated region body
PF: predicated region fallthrough
CT: control target
= control target key end

     0   :  { %s1001_s0 = inlined_call_operand.hbm [shape: f32[2,8,256], index: 0, kind: input, shape index: {}]   ;;  %s1002_s1 = inlined_call_operand.vmem [shape: f32[2,4,256], index: 1, kind: input, shape index: {}]   ;;  %s1003_s2 = inlined_call_operand.hbm [shape: f32[8,8], index: 2, kind: input, shape index: {}]   ;;  %s1004_s3 = inlined_call_operand.vmem [shape: f32[8,4], index: 3, kind: input, shape index: {}]   ;;  %s1005_s4 = inlined_call_operand.vmem [shape: f32[8,1], index: 4, kind: input, shape index: {}]   ;;  %s1006_s5 = inlined_call_operand.hbm [shape: f32[2,8,256], index: 5, kind: output, shape index: {}]  }
   0x1   :  { %1014 = sst [smem:[#allocation16_spill]] %s1003_s2 }
   0x2   :  { %1015 = sst [smem:[#allocation17_spill]] %s1005_s4 }
   0x3   :  { %1016 = sst [smem:[#allocation18_spill]] %s1006_s5 }
   0x4   :  { %10 = vsyncpa [#allocation3], 0 }
   0x5   :  { %12 = vsyncpa [#allocation3 + $0x1], 0 }
   0x6   :  { %13 = vsyncpa [#allocation6], 0 }
   0x7   :  { %14 = vsyncpa [#allocation4], 0 }
   0x8   :  { %16 = vsyncpa [#allocation4 + $0x1], 0  ;;  %s811_s18 = smov 0   ;;  %s813_s19 = smov 0  }
   0x9   :  { %s815_s20 = smov 0   ;;  %s817_s21 = smov 0  }
   0xa   :  { %s819_s22 = smov 0   ;;  %s821_s23 = smov 0  }
   0xb   :  { %s823_s24 = smov 0   ;;  %s825_s25 = smov 0  }
   0xc LB: > { %1017 = sst [smem:[#allocation11_spill]] %s749_s18  ;;  %s502_s26 = sadd.s32 4294967295, %s777_s25   ;;  %s777_s25 = sphi %s825_s25, %s22_s25   ;;  %s773_s24 = sphi %s823_s24, %s1043_s24   ;;  %s769_s23 = sphi %s821_s23, %s1042_s23   ;;  %s765_s22 = sphi %s819_s22, %s1041_s22   ;;  %s761_s21 = sphi %s817_s21, %s1040_s21   ;;  %s757_s20 = sphi %s815_s20, %s1039_s20   ;;  %s753_s19 = sphi %s813_s19, %s1038_s19   ;;  %s749_s18 = sphi %s811_s18, %s1037_s18  }
   0xd   : > { %s503_s27 = sadd.s32 4294967294, %s777_s25   ;;  %p56_p0 = scmp.ne.s32.totalorder %s753_s19, %s749_s18 }
   0xe   : > { %p855_p1 = scmp.eq.s32.totalorder %s502_s26, 0  ;;  %p859_p2 = scmp.eq.s32.totalorder %s502_s26, 3 }
   0xf   : > { %p179_p3 = scmp.eq.s32.totalorder %s503_s27, 3  ;;  %p504_p5 = scmp.ge.s32.totalorder %s777_s25, 1 }
  0x10   : > { %p865_p4 = por %p855_p1, %p56_p0  ;;  %p186_p7 = scmp.lt.s32.totalorder %s777_s25, 5 }
  0x11   : > { %p870_p6 = por %p179_p3, %p56_p0  ;;  %s1023_s2 = sld [smem:[#allocation16_spill]] }
  0x12   : > { %p878_p8 = pnand %p504_p5, %p186_p7  ;;  %s779_s11 = smov [#allocation5]  }
  0x13   : > { %s1021_s6 = scalar_select %p870_p6, 1, 0 }
  0x14   : > { %p532_p9 = pneg %p878_p8  ;;  %s200_s12 = sshll.u32 %s779_s11, 4  ;;  %s201_s12 = int_to_ptr.vmem [resolvable:$true] %s200_s12 }
  0x15   : > { %1022 = sst [smem:[#allocation12_spill]] %s1021_s6  ;;  %s31_s13 = sadd.s32 1, %s769_s23 }
  0x16   : > { %p533_p10 = pnand %p532_p9, %p855_p1  ;;  %p32_p11 = scmp.ge.s32.totalorder %s31_s13, 2 }
  0x17   : > { %s198_s9 = sshll.u32 %s1023_s2, 4  ;;  %s34_s14 = sadd.s32 1, %s773_s24  ;;  %s199_s9 = int_to_ptr.hbm [resolvable:$true] %s198_s9 }
  0x18   : > { %535 = dma.hbm_to_vmem [thread:$0]  (!%p533_p10), %s199_s9, 128, %s201_s12, [#allocation6]  }
  0x19   : > { %s43_s15 = sadd.s32 1, %s757_s20  ;;  %p50_p12 = scmp.ne.s32.totalorder %s757_s20, %s753_s19 }
  0x1a   : > { %s1045_s13 = smov (%p32_p11, %s31_s13), 0  ;;  %s1047_s14 = smov (!%p32_p11, %s34_s14), %s773_s24 }
  0x1b   : > { %1025 = sst [smem:[#allocation13_spill]] %s1045_s13  ;;  %s39_s16 = ssub.s32 %s769_s23, %s1045_s13 }
  0x1c   : > { %p51_p13 = scmp.eq.s32.totalorder %s777_s25, 0  ;;  %p36_p0 = scmp.ge.s32.totalorder %s1047_s14, 2 }
  0x1d   : > { %p899_p3 = por %p859_p2, %p50_p12  ;;  %p545_p7 = scmp.lt.s32.totalorder %s777_s25, 4 }
  0x1e   : > { %p903_p5 = por %p51_p13, %p50_p12  ;;  %s1049_s14 = smov (%p36_p0, %s1047_s14), 0 }
  0x1f   : > { %s1026_s17 = scalar_select %p899_p3, 1, 0 }
  0x20   : > { %1029 = sst [smem:[#allocation15_spill]] %s1049_s14  ;;  %s217_s27 = sand.u32 1, %s757_s20  }
  0x21   : > { %1027 = sst [smem:[#allocation14_spill]] %s1026_s17  ;;  %s508_s7 = sshll.u32 %s773_s24, 1 }
  0x22   : > { %s38_s8 = ssub.s32 %s773_s24, %s1049_s14  ;;  %s507_s11 = sshll.u32 %s217_s27, 3 }
  0x23   : > { %s40_s9 = sor.u32 %s39_s16, %s38_s8  ;;  %s225_s29 = sadd.s32 %s769_s23, %s508_s7 }
  0x24   : > { %p41_p9 = scmp.eq.s32.totalorder %s40_s9, 0  ;;  %s221_s12 = scalar_lea.vmem [#allocation2], %s507_s11 }
  0x25   : > { %s231_s2 = sshll.u32 %s221_s12, 4  ;;  %s509_s6 = sshll.u32 %s225_s29, 3  ;;  %s232_s2 = int_to_ptr.vmem [resolvable:$true] %s231_s2 }
  0x26   : > { %s916_s13 = scalar_select %p41_p9, %s757_s20, %s43_s15  }
  0x27   : > { %s227_s5 = scalar_lea.hbm %s1001_s0, %s509_s6  ;;  %p537_p2 = pnand %p545_p7, %p903_p5 }
  0x28   : > { %s229_s4 = sshll.u32 %s227_s5, 4  ;;  %s218_s14 = scalar_lea.sflag [#allocation3], %s217_s27  ;;  %s230_s4 = int_to_ptr.hbm [resolvable:$true] %s229_s4 }
  0x29   : > { %539 = dma.hbm_to_vmem [thread:$0]  (!%p537_p2), %s230_s4, 128, %s232_s2, %s218_s14  }
  0x2a   : > { %251 = sbr.rel (%p878_p8) target bundleno = 193 (0xc1), region = 40  ;;  %s928_s15 = sand.u32 (!%p878_p8), 1, %s753_s19  }
  0x2b   : > { %s511_s16 = sshll.u32 (!%p878_p8), %s928_s15, 3  ;;  %s254_s18 = scalar_lea.sflag (!%p878_p8), [#allocation3], %s928_s15 }
  0x2c   : > { %s257_s6 = scalar_lea.vmem (!%p878_p8), [#allocation2], %s511_s16 }
  0x2f   : > { %736 = dma.done.wait (%p865_p4), %s254_s18, 128  }
  0x30   : > { %738 = vsyncadd (%p865_p4), %s254_s18, 4294967168 }
  0x31   : > { %740 = dma.done.wait (%p855_p1), [#allocation6], 128  }
  0x32   : > { %742 = vsyncadd (%p855_p1), [#allocation6], 4294967168  ;;  %p298_p8 = scmp.lt.s32.totalorder %s765_s22, 1  ;;  %p300_p10 = scmp.lt.s32.totalorder %s761_s21, 1  ;;  %v780_v0 = vmov 0   ;;  %vm315_vm0 = vcmask 1043456  }
  0x33   : > { %614 = vset.pattern.permute.xlu0 %v780_v0  ;;  %v306_v1 = vld [vmem:[%s257_s6] sm:$0xff]  ;;  %vm311_vm1 = vcmask 31744   ;;  %v308_v5 = vld [vmem:[#allocation5] sm:$0xff]  ;;  %vm339_vm2 = vcmask 64512   ;;  %s1030_s9 = sld [smem:[#allocation17_spill]]  ;;  %s520_s11 = sshll.u32 %s765_s22, 1 }
  0x34   : > { %s299_s2 = scalar_select %p298_p8, %s765_s22, 1  ;;  %v309_v2 = vld [vmem:[%s1004_s3] sm:$0xff]  ;;  %v307_v4 = vmax.f32 %v306_v1, 0.0 }
  0x35   : > { %s301_s4 = scalar_select %p300_p10, %s761_s21, 1 }
  0x36   : > { %s514_s5 = sshll.u32 %s299_s2, 1  ;;  %358 = vmatpush.msra.mxu1 %v307_v4  ;;  %s382_s29 = sadd.s32 %s761_s21, %s520_s11 }
  0x37   : > { %s303_s10 = sadd.s32 %s514_s5, %s301_s4  ;;  %518 = vmatmul.msk.f32.vlgmr.msra.gmra.mxu1 %vm339_vm2, %v308_v5  ;;  %s521_s12 = sshll.u32 %s382_s29, 3 }
  0x38   : > { %s515_s30 = sshll.u32 %s303_s10, 2  ;;  %s1031_s2 = sld [smem:[#allocation18_spill]] }
  0x39   : > { %s305_s28 = scalar_lea.vmem %s1002_s1, %s515_s30  ;;  %v363_v6 = vld [vmem:[%s1030_s9] sm:$0xff]  ;;  %s297_s10 = scalar_lea.vmem [#allocation7], %s511_s16 }
  0x3a   : > { %v310_v3 = vld [vmem:[%s305_s28] sm:$0xf]  ;;  %366 = vperm.xlu0 %614, %v363_v6   ;;  %s386_s30 = sshll.u32 %s297_s10, 4  ;;  %s372_s22 = scalar_lea.sflag [#allocation4], %s928_s15  ;;  %s387_s30 = int_to_ptr.vmem [resolvable:$true] %s386_s30 }
  0x3b   : > { %516 = vmatpush.msk.msra.mxu0 %vm315_vm0, %v310_v3 }
  0x3c   : > { %517 = vmatmul.msk.f32.vlgmr.msra.gmra.mxu0 %vm311_vm1, %v309_v2 }
  0x3e   : > { %s384_s4 = scalar_lea.hbm %s1031_s2, %s521_s12  ;;  %s695_s27 = scalar_lea.hbm %s1031_s2, 32 }
  0x3f   : > { %s388_s14 = sshll.u32 %s384_s4, 4  ;;  %s389_s14 = int_to_ptr.hbm [resolvable:$true] %s388_s14 }
  0x40   : > { %s689_s21 = sshra.s32 %s389_s14, 4  ;;  %s690_s21 = int_to_ptr.hbm [resolvable:$true] %s689_s21 }
  0x41   : > { %s691_s17 = scalar_lea.hbm %s690_s21, 8  ;;  %p696_p12 = scmp.lt.s32.totalorder %s690_s21, %s1031_s2 }
  0x42   : > { %p692_p1 = scmp.ne.s32.totalorder %s690_s21, %s691_s17  ;;  %p697_p13 = scmp.lt.s32.totalorder %s695_s27, %s691_s17 }
  0x44   : > { %p693_p4 = pnand %p692_p1, %p899_p3  ;;  %p698_p0 = por %p697_p13, %p696_p12 }
  0x46   : > { %p694_p11 = pneg %p693_p4 }
  0x48   : > { %p699_p5 = pnand %p698_p0, %p694_p11 }
  0xac   : > { %v367_v9 = vpop.permute.xlu0 %366 }
  0xb4   : > { %v360_v8 = vpop.f32.mrf.mxu1 }
  0xb9   : > { %v336_v7 = vpop.f32.mrf.mxu0 }
  0xba   : > { %v361_v10 = vadd.f32 %v360_v8, %v336_v7 }
  0xbc   : > { %v369_v11 = vadd.f32 %v367_v9, %v361_v10 }
  0xbe   : > { %370 = vst [vmem:[%s297_s10] sm:$0xff] %v369_v11 }
  0xbf   : > { %702 = shalt.err (!%p699_p5)
}
  0xc0   : > { %530 = dma.vmem_to_hbm [thread:$0]  (%p899_p3), %s387_s30, 128, %s389_s14, %s372_s22  }
  0xc1 PF: > { %s1033_s15 = sld [smem:[#allocation11_spill]]  ;;  %p547_p7 = scmp.ge.s32.totalorder %s777_s25, 2 }
  0xc3   : > { %p541_p9 = pnand %p547_p7, %p870_p6 }
  0xc5   : > { %p542_p2 = pneg %p541_p9 }
  0xc7   : > { %s400_s9 = sand.u32 1, %s1033_s15  }
  0xc8   : > { %s401_s11 = scalar_lea.sflag [#allocation4], %s400_s9 }
  0xc9   : > { %744 = dma.done.wait (%p542_p2), %s401_s11, 128  }
  0xca   : > { %746 = vsyncadd (%p542_p2), %s401_s11, 4294967168  ;;  %s22_s25 = sadd.s32 1, %s777_s25   ;;  %s1035_s29 = sld [smem:[#allocation13_spill]] }
  0xcb   : > { %p19_p8 = scmp.ge.s32.totalorder %s22_s25, 6   ;;  %s1036_s12 = sld [smem:[#allocation15_spill]] }
  0xcc   : > { %s1037_s18 = smov %s753_s19  ;;  %s1038_s19 = smov %s757_s20 }
  0xcd   : > { %s1039_s20 = smov %s916_s13  ;;  %s1040_s21 = smov %s769_s23 }
  0xce   : > { %s1041_s22 = smov %s773_s24  ;;  %21 = sbr.rel (!%p19_p8) target bundleno = 12 (0xc), region = 92 }
  0xd0   : > { %s1042_s23 = smov %s1035_s29 }
  0xd1   : > { %s1043_s24 = smov %s1036_s12 }
  0xd3   :  { %407 = vsyncpa [#allocation3], 1 }
  0xd4   :  { %409 = vsyncpa [#allocation3 + $0x1], 1 }
  0xd5   :  { %410 = vsyncpa [#allocation6], 1 }
  0xd6   :  { %411 = vsyncpa [#allocation4], 1 }
  0xd7   :  { %413 = vsyncpa [#allocation4 + $0x1], 1 }

</bundles_post_ra>
